<compile_context>
chip_gen: v7x
topology: tpu7x:2x2x1
jax: 0.10.0
libtpu: 0.0.40
codegen_flags: <defaults>
</compile_context>

<pallas_src>
import jax
import jax.numpy as jnp
from jax.experimental import pallas as pl
from jax.experimental.pallas import tpu as pltpu


def _cdiv(a, b):
    return (a + b - 1) // b


def _round_up(a, b):
    return _cdiv(a, b) * b


def _make_gain_pow_loss_kernel(*, tr, lanes, rows_per_core_pad, full_rows,
                               rem_lanes, need_mask):
    """Kernel over blocks of shape (1, tr, lanes); accumulates into a
    (1, 8, lanes) per-core output block.  Closes over Python scalars only."""
    groups = tr // 8
    clamp_min = 1e-6  # Python float -> stays a literal inside the trace.

    def kernel(est_ref, ora_ref, out_ref):
        i = pl.program_id(1)

        @pl.when(i == 0)
        def _():
            out_ref[...] = jnp.zeros_like(out_ref)

        if need_mask:
            p = pl.program_id(0)
            block_base_row = p * rows_per_core_pad + i * tr
            row_iota = jax.lax.broadcasted_iota(jnp.int32, (1, 8, lanes), 1)
            lane_iota = jax.lax.broadcasted_iota(jnp.int32, (1, 8, lanes), 2)
            lane_in_last_row = lane_iota < rem_lanes  # hoisted out of the loop

        # Stream the block 8 sublanes at a time; everything stays in the VPU
        # slot and the accumulator stays in vregs.
        acc = None
        for g in range(groups):
            e = est_ref[:, g * 8:(g + 1) * 8, :].astype(jnp.float32)
            o = ora_ref[:, g * 8:(g + 1) * 8, :].astype(jnp.float32)
            d = e - o
            d2 = d * d                              # |d|^2 (real inputs)
            v = jnp.maximum(d2 * d2, clamp_min)     # clamp(|d|^4, 1e-6)
            if need_mask:
                grow = block_base_row + (g * 8) + row_iota
                valid = (grow < full_rows) | ((grow == full_rows)
                                              & lane_in_last_row)
                v = jnp.where(valid, v, 0.0)
            acc = v if acc is None else acc + v

        out_ref[...] += acc

    return kernel


def gain_pow_loss(estimated_gains, oracle_gains, *,
                  lanes=512, max_block_rows=1024, num_cores=2):
    assert estimated_gains.shape == oracle_gains.shape
    assert estimated_gains.ndim >= 2, "GainPowLoss expects >= 2-D gains"

    n = int(estimated_gains.size)
    full_rows = n // lanes
    rem_lanes = n % lanes

    # Tile sizing: rows are multiples of 8 (sublane constraint); block rows
    # capped so 2 inputs x 2 pipeline buffers stay well inside scoped VMEM.
    rows_total = _cdiv(n, lanes)
    rows_per_core = _cdiv(rows_total, num_cores)
    tr = min(max_block_rows, _round_up(max(rows_per_core, 1), 8))
    steps = _cdiv(rows_per_core, tr)
    rows_per_core_pad = steps * tr
    n_pad = num_cores * rows_per_core_pad * lanes
    need_mask = (n_pad != n)

    est_flat = estimated_gains.reshape(-1)
    ora_flat = oracle_gains.reshape(-1)
    if need_mask:
        pad = n_pad - n
        est_flat = jnp.pad(est_flat, (0, pad))
        ora_flat = jnp.pad(ora_flat, (0, pad))
    est3 = est_flat.reshape(num_cores, rows_per_core_pad, lanes)
    ora3 = ora_flat.reshape(num_cores, rows_per_core_pad, lanes)

    kernel = _make_gain_pow_loss_kernel(
        tr=tr, lanes=lanes, rows_per_core_pad=rows_per_core_pad,
        full_rows=full_rows, rem_lanes=rem_lanes, need_mask=need_mask)

    itemsize = jnp.dtype(estimated_gains.dtype).itemsize
    cost = pl.CostEstimate(
        flops=5 * n_pad,
        transcendentals=0,
        bytes_accessed=2 * n_pad * itemsize + num_cores * 8 * lanes * 4,
    )

    partials = pl.pallas_call(
        kernel,
        out_shape=jax.ShapeDtypeStruct((num_cores, 8, lanes), jnp.float32),
        grid_spec=pltpu.PrefetchScalarGridSpec(
            num_scalar_prefetch=0,
            grid=(num_cores, steps),
            in_specs=[
                pl.BlockSpec((1, tr, lanes), lambda p, i: (p, i, 0)),
                pl.BlockSpec((1, tr, lanes), lambda p, i: (p, i, 0)),
            ],
            out_specs=pl.BlockSpec((1, 8, lanes), lambda p, i: (p, 0, 0)),
        ),
        compiler_params=pltpu.CompilerParams(
            dimension_semantics=("parallel", "arbitrary"),
            vmem_limit_bytes=32 * 1024 * 1024,
        ),
        cost_estimate=cost,
    )(est3, ora3)

    # Tiny epilogue: one cross-lane reduce of (num_cores, 8, lanes) + scale.
    return jnp.sum(partials) * (1.0 / n)


def _reference(estimated_gains, oracle_gains):
    gain_error = jnp.abs(estimated_gains - oracle_gains) ** 2
    return jnp.mean(jnp.mean(jnp.maximum(gain_error ** 2, 1e-6), axis=-2))


if __name__ == "__main__":
    key = jax.random.PRNGKey(0)
    k1, k2, k3, k4 = jax.random.split(key, 4)

    # Primary case: (batch=2, channels=4, freq=16, time=16)
    shape = (2, 4, 16, 16)
    estimated_gains = jax.random.uniform(k1, shape, dtype=jnp.float32)
    oracle_gains = jax.random.uniform(k2, shape, dtype=jnp.float32)

    loss = gain_pow_loss(estimated_gains, oracle_gains)
    loss = jax.block_until_ready(loss)
    ref = _reference(estimated_gains, oracle_gains)
    assert jnp.allclose(loss, ref, rtol=1e-5, atol=1e-7), (loss, ref)

    # Awkward, non-divisible shape: exercises padding + exact tail masking.
    shape2 = (3, 5, 7, 9)
    est2 = jax.random.uniform(k3, shape2, dtype=jnp.float32)
    ora2 = jax.random.uniform(k4, shape2, dtype=jnp.float32)
    loss2 = jax.block_until_ready(gain_pow_loss(est2, ora2))
    ref2 = _reference(est2, ora2)
    assert jnp.allclose(loss2, ref2, rtol=1e-5, atol=1e-7), (loss2, ref2)

    print("KERNEL_OK")
</pallas_src>

<mosaic_0001>
module attributes {stable_mosaic.version = 11 : i64} {
  func.func @kernel(%arg0: i32, %arg1: i32, %arg2: memref<1x8x512xf32, #tpu.memory_space<vmem>>, %arg3: memref<1x8x512xf32, #tpu.memory_space<vmem>>, %arg4: memref<1x8x512xf32, #tpu.memory_space<vmem>>) attributes {dimension_semantics = [#tpu.dimension_semantics<parallel>, #tpu.dimension_semantics<arbitrary>], iteration_bounds = array<i64: 2, 1>, scalar_prefetch = 0 : i64, scratch_operands = 0 : i64, tpu.core_type = #tpu.core_type<tc>, window_params = [{transform_indices = @transform_0, window_bounds = array<i64: 1, 8, 512>}, {transform_indices = @transform_1, window_bounds = array<i64: 1, 8, 512>}, {transform_indices = @transform_2, window_bounds = array<i64: 1, 8, 512>}]} {
    %c0_i32 = arith.constant 0 : i32
    %0 = arith.cmpi eq, %arg1, %c0_i32 : i32
    %1 = arith.extui %0 : i1 to i32
    %c0_i32_0 = arith.constant 0 : i32
    %2 = arith.cmpi ne, %1, %c0_i32_0 : i32
    scf.if %2 {
      %cst_17 = arith.constant 0.000000e+00 : f32
      %31 = vector.broadcast %cst_17 : f32 to vector<1x8x512xf32>
      %c0_18 = arith.constant 0 : index
      %c0_19 = arith.constant 0 : index
      %c0_20 = arith.constant 0 : index
      %32 = vector.load %arg4[%c0_18, %c0_19, %c0_20] : memref<1x8x512xf32, #tpu.memory_space<vmem>>, vector<1x8x512xf32>
      tpu.vector_store %arg4[%c0_18, %c0_19, %c0_20], %31 {strides = array<i32>} : memref<1x8x512xf32, #tpu.memory_space<vmem>>, vector<1x8x512xf32>,
    } else {
    }
    %c8_i32 = arith.constant 8 : i32
    %3 = arith.muli %arg0, %c8_i32 : i32
    %c8_i32_1 = arith.constant 8 : i32
    %4 = arith.muli %arg1, %c8_i32_1 : i32
    %5 = arith.addi %3, %4 : i32
    %6 = tpu.iota {dimensions = array<i32: 1>} : vector<1x8x512xi32>
    %7 = tpu.iota {dimensions = array<i32: 2>} : vector<1x8x512xi32>
    %c0_i32_2 = arith.constant 0 : i32
    %8 = vector.broadcast %c0_i32_2 : i32 to vector<1x8x512xi32>
    %9 = arith.cmpi slt, %7, %8 : vector<1x8x512xi32>
    %c0 = arith.constant 0 : index
    %c0_3 = arith.constant 0 : index
    %c0_4 = arith.constant 0 : index
    %10 = vector.load %arg2[%c0, %c0_3, %c0_4] : memref<1x8x512xf32, #tpu.memory_space<vmem>>, vector<1x8x512xf32>
    %c0_5 = arith.constant 0 : index
    %c0_6 = arith.constant 0 : index
    %c0_7 = arith.constant 0 : index
    %11 = vector.load %arg3[%c0_5, %c0_6, %c0_7] : memref<1x8x512xf32, #tpu.memory_space<vmem>>, vector<1x8x512xf32>
    %12 = arith.subf %10, %11 : vector<1x8x512xf32>
    %13 = arith.mulf %12, %12 : vector<1x8x512xf32>
    %14 = arith.mulf %13, %13 : vector<1x8x512xf32>
    %cst = arith.constant 9.99999997E-7 : f32
    %15 = vector.broadcast %cst : f32 to vector<1x8x512xf32>
    %16 = arith.maximumf %14, %15 : vector<1x8x512xf32>
    %c0_i32_8 = arith.constant 0 : i32
    %17 = arith.addi %5, %c0_i32_8 : i32
    %18 = vector.broadcast %17 : i32 to vector<1x8x512xi32>
    %19 = arith.addi %18, %6 : vector<1x8x512xi32>
    %c4_i32 = arith.constant 4 : i32
    %20 = vector.broadcast %c4_i32 : i32 to vector<1x8x512xi32>
    %21 = arith.cmpi slt, %19, %20 : vector<1x8x512xi32>
    %c4_i32_9 = arith.constant 4 : i32
    %22 = vector.broadcast %c4_i32_9 : i32 to vector<1x8x512xi32>
    %23 = arith.cmpi eq, %19, %22 : vector<1x8x512xi32>
    %24 = arith.andi %23, %9 : vector<1x8x512xi1>
    %25 = arith.ori %21, %24 : vector<1x8x512xi1>
    %cst_10 = arith.constant 0.000000e+00 : f32
    %26 = vector.broadcast %cst_10 : f32 to vector<1x8x512xf32>
    %27 = arith.select %25, %16, %26 : vector<1x8x512xi1>, vector<1x8x512xf32>
    %c0_11 = arith.constant 0 : index
    %c0_12 = arith.constant 0 : index
    %c0_13 = arith.constant 0 : index
    %28 = vector.load %arg4[%c0_11, %c0_12, %c0_13] : memref<1x8x512xf32, #tpu.memory_space<vmem>>, vector<1x8x512xf32>
    %29 = arith.addf %28, %27 : vector<1x8x512xf32>
    %c0_14 = arith.constant 0 : index
    %c0_15 = arith.constant 0 : index
    %c0_16 = arith.constant 0 : index
    %30 = vector.load %arg4[%c0_14, %c0_15, %c0_16] : memref<1x8x512xf32, #tpu.memory_space<vmem>>, vector<1x8x512xf32>
    tpu.vector_store %arg4[%c0_14, %c0_15, %c0_16], %29 {strides = array<i32>} : memref<1x8x512xf32, #tpu.memory_space<vmem>>, vector<1x8x512xf32>,
    return
  }
  func.func @transform_0(%arg0: i32, %arg1: i32) -> (i32, i32, i32) {
    %c0_i32 = arith.constant 0 : i32
    %c0_i32_0 = arith.constant 0 : i32
    return %arg0, %arg1, %c0_i32 : i32, i32, i32
  }
  func.func @transform_1(%arg0: i32, %arg1: i32) -> (i32, i32, i32) {
    %c0_i32 = arith.constant 0 : i32
    %c0_i32_0 = arith.constant 0 : i32
    return %arg0, %arg1, %c0_i32 : i32, i32, i32
  }
  func.func @transform_2(%arg0: i32, %arg1: i32) -> (i32, i32, i32) {
    %c0_i32 = arith.constant 0 : i32
    %c0_i32_0 = arith.constant 0 : i32
    %c0_i32_1 = arith.constant 0 : i32
    return %arg0, %c0_i32, %c0_i32_0 : i32, i32, i32
  }
}

</mosaic_0001>

<bundles_post_ra>
// kernel: tpu_custom_call.1
= control target key start
LH: loop header
LB: loop body
LE: loop exit
PB: predicated region body
PF: predicated region fallthrough
CT: control target
= control target key end

     0   :  { %7 = vsyncpa [#allocation3], 0  ;;  %s897_s0 = inlined_call_operand.hbm [shape: f32[2,8,512], index: 0, kind: input, shape index: {}]   ;;  %s898_s1 = inlined_call_operand.hbm [shape: f32[2,8,512], index: 1, kind: input, shape index: {}]   ;;  %s899_s2 = inlined_call_operand.hbm [shape: f32[2,8,512], index: 2, kind: output, shape index: {}]  }
   0x1   :  { %9 = vsyncpa [#allocation3 + $0x1], 0 }
   0x2   :  { %10 = vsyncpa [#allocation6], 0 }
   0x3   :  { %12 = vsyncpa [#allocation6 + $0x1], 0 }
   0x4   :  { %13 = vsyncpa [#allocation4], 0 }
   0x5   :  { %15 = vsyncpa [#allocation4 + $0x1], 0  ;;  %s671_s9 = smov 0   ;;  %s673_s10 = smov 0  }
   0x6   :  { %s675_s11 = smov 0   ;;  %s677_s12 = smov 0  }
   0x7   :  { %s679_s13 = smov 0   ;;  %s681_s14 = smov 0  }
   0x8 LB: > { %s414_s15 = sadd.s32 4294967295, %s651_s14   ;;  %s415_s16 = sadd.s32 4294967294, %s651_s14   ;;  %s651_s14 = sphi %s681_s14, %s21_s14   ;;  %s647_s13 = sphi %s679_s13, %s919_s13   ;;  %s643_s12 = sphi %s677_s12, %s918_s12   ;;  %s639_s11 = sphi %s675_s11, %s917_s11   ;;  %s635_s10 = sphi %s673_s10, %s916_s10   ;;  %s631_s9 = sphi %s671_s9, %s915_s9  }
   0x9   : > { %s33_s17 = sadd.s32 1, %s647_s13  ;;  %s42_s18 = sadd.s32 1, %s639_s11 }
   0xa   : > { %p35_p0 = scmp.ge.s32.totalorder %s33_s17, 2  ;;  %p49_p1 = scmp.ne.s32.totalorder %s639_s11, %s635_s10 }
   0xb   : > { %p50_p2 = scmp.eq.s32.totalorder %s651_s14, 0  ;;  %p55_p3 = scmp.ne.s32.totalorder %s635_s10, %s631_s9 }
   0xc   : > { %s921_s17 = smov (%p35_p0, %s33_s17), 0  ;;  %p56_p5 = scmp.eq.s32.totalorder %s414_s15, 0 }
   0xd   : > { %p712_p4 = por %p50_p2, %p49_p1  ;;  %s37_s20 = ssub.s32 %s647_s13, %s921_s17 }
   0xe   : > { %p107_p6 = scmp.eq.s32.totalorder %s414_s15, 1  ;;  %p40_p7 = scmp.eq.s32.totalorder %s37_s20, 0 }
   0xf   : > { %p718_p8 = por %p56_p5, %p55_p3  ;;  %p113_p10 = scmp.eq.s32.totalorder %s415_s16, 1 }
  0x10   : > { %p722_p9 = por %p107_p6, %p49_p1  ;;  %p454_p13 = scmp.lt.s32.totalorder %s651_s14, 2 }
  0x11   : > { %s903_s21 = scalar_select %p718_p8, 1, 0 }
  0x12   : > { %s904_s22 = scalar_select %p722_p9, 1, 0 }
  0x13   : > { %s727_s23 = scalar_select %p40_p7, %s639_s11, %s42_s18  }
  0x14   : > { %p729_p11 = por %p113_p10, %p55_p3  ;;  %s736_s25 = sand.u32 1, %s639_s11  }
  0x15   : > { %s418_s26 = sshll.u32 %s736_s25, 5  ;;  %s434_s27 = sshll.u32 %s647_s13, 9 }
  0x16   : > { %s905_s24 = scalar_select %p729_p11, 1, 0 }
  0x17   : > { %s745_s30 = scalar_lea.hbm %s897_s0, %s434_s27  ;;  %s137_s3 = scalar_lea.vmem [#allocation2], %s418_s26 }
  0x18   : > { %s147_s4 = sshll.u32 %s137_s3, 4  ;;  %p753_p0 = pnand %p454_p13, %p712_p4  ;;  %s749_s4 = int_to_ptr.vmem [resolvable:$true] %s147_s4 }
  0x19   : > { %s134_s6 = scalar_lea.sflag [#allocation3], %s736_s25  ;;  %s505_s7 = scalar_lea.hbm %s745_s30, 512 }
  0x1a   : > { %p506_p3 = scmp.ne.s32.totalorder %s745_s30, %s505_s7  ;;  %p507_p5 = pneg %p753_p0 }
  0x1b   : > { %s510_s16 = scalar_lea.hbm %s897_s0, 1024  ;;  %p511_p4 = scmp.lt.u32.totalorder %s745_s30, %s897_s0 }
  0x1c   : > { %p508_p6 = pnand %p507_p5, %p506_p3  ;;  %p512_p10 = scmp.lt.u32.totalorder %s510_s16, %s505_s7 }
  0x1d   : > { %p514_p12 = scmp.lt.u32.totalorder %s505_s7, %s745_s30 }
  0x1e   : > { %p509_p7 = pneg %p508_p6  ;;  %p513_p13 = por %p512_p10, %p511_p4 }
  0x20   : > { %p515_p1 = por %p514_p12, %p513_p13 }
  0x22   : > { %p516_p2 = pnand %p515_p1, %p509_p7 }
  0x24   : > { %519 = shalt.err (!%p516_p2)
}
  0x25   : > { %s520_s20 = scalar_lea.vmem %s749_s4, 512  ;;  %s653_s28 = smov [#allocation2]  }
  0x26   : > { %p521_p3 = scmp.ne.s32.totalorder %s749_s4, %s520_s20  ;;  %s525_s29 = sshll.u32 %s653_s28, 4  ;;  %s526_s29 = int_to_ptr.vmem [resolvable:$false] %s525_s29 }
  0x27   : > { %s527_s3 = scalar_lea.vmem %s526_s29, 1024  ;;  %p528_p9 = scmp.lt.s32.totalorder %s749_s4, %s526_s29 }
  0x28   : > { %p523_p6 = pnand %p521_p3, %p507_p5  ;;  %p529_p4 = scmp.lt.s32.totalorder %s527_s3, %s520_s20 }
  0x2a   : > { %p524_p11 = pneg %p523_p6  ;;  %p530_p10 = por %p529_p4, %p528_p9 }
  0x2c   : > { %p531_p12 = pnand %p530_p10, %p524_p11 }
  0x2e   : > { %534 = shalt.err (!%p531_p12)
}
  0x2f   : > { %446 = dma.hbm_to_vmem [thread:$0]  (!%p753_p0), %s745_s30, 512, %s749_s4, %s134_s6  }
  0x30   : > { %p907_p1 = scmp.lt.s32.totalorder %s651_s14, 3  ;;  %p908_p2 = scmp.ge.s32.totalorder %s651_s14, 1 }
  0x31   : > { %s798_s16 = scalar_lea.hbm %s898_s1, %s434_s27  ;;  %s158_s18 = scalar_lea.vmem [#allocation5], %s418_s26 }
  0x32   : > { %p789_p7 = pnand %p908_p2, %p907_p1  ;;  %s168_s19 = sshll.u32 %s158_s18, 4  ;;  %s169_s19 = int_to_ptr.vmem [resolvable:$true] %s168_s19 }
  0x33   : > { %s155_s30 = scalar_lea.sflag [#allocation6], %s736_s25  ;;  %s535_s4 = scalar_lea.hbm %s798_s16, 512 }
  0x34   : > { %s909_s7 = scalar_select %p789_p7, 1, 0 }
  0x35   : > { %p536_p9 = scmp.ne.s32.totalorder %s798_s16, %s535_s4  ;;  %s540_s27 = scalar_lea.hbm %s898_s1, 1024 }
  0x36   : > { %p541_p3 = scmp.lt.u32.totalorder %s798_s16, %s898_s1  ;;  %p542_p6 = scmp.lt.u32.totalorder %s540_s27, %s535_s4 }
  0x37   : > { %p538_p11 = pnand %p536_p9, %p507_p5  ;;  %p544_p10 = scmp.lt.u32.totalorder %s535_s4, %s798_s16 }
  0x38   : > { %p543_p4 = por %p542_p6, %p541_p3 }
  0x39   : > { %p539_p13 = pneg %p538_p11 }
  0x3a   : > { %p545_p12 = por %p544_p10, %p543_p4 }
  0x3c   : > { %p546_p1 = pnand %p545_p12, %p539_p13 }
  0x3e   : > { %549 = shalt.err (!%p546_p1)
}
  0x3f   : > { %s550_s25 = scalar_lea.vmem %s169_s19, 512  ;;  %s654_s26 = smov [#allocation5]  }
  0x40   : > { %p551_p2 = scmp.ne.s32.totalorder %s169_s19, %s550_s25  ;;  %s555_s3 = sshll.u32 %s654_s26, 4  ;;  %s556_s3 = int_to_ptr.vmem [resolvable:$false] %s555_s3 }
  0x41   : > { %s557_s8 = scalar_lea.vmem %s556_s3, 1024  ;;  %p558_p8 = scmp.lt.s32.totalorder %s169_s19, %s556_s3 }
  0x42   : > { %p553_p9 = pnand %p551_p2, %p507_p5  ;;  %p559_p7 = scmp.lt.s32.totalorder %s557_s8, %s550_s25 }
  0x44   : > { %p554_p11 = pneg %p553_p9  ;;  %p560_p3 = por %p559_p7, %p558_p8 }
  0x46   : > { %p561_p6 = pnand %p560_p3, %p554_p11 }
  0x48   : > { %564 = shalt.err (!%p561_p6)
}
  0x49   : > { %449 = dma.hbm_to_vmem [thread:$0]  (!%p753_p0), %s798_s16, 512, %s169_s19, %s155_s30  }
  0x4a   : > { %p910_p13 = scmp.ne.s32.totalorder %s909_s7, 0 }
  0x4b   : > { %s825_s15 = sand.u32 (!%p910_p13), 1, %s635_s10   ;;  %p911_p8 = scmp.ne.s32.totalorder (!%p910_p13), %s903_s21, 0 }
  0x4c   : > { %177 = sbr.rel (%p910_p13) target bundleno = 113 (0x71), region = 28  ;;  %s828_s18 = sshll.u32 (!%p910_p13), %s825_s15, 5 }
  0x4d   : > { %s180_s4 = scalar_lea.sflag (!%p910_p13), [#allocation3], %s825_s15  ;;  %s183_s6 = scalar_lea.vmem (!%p910_p13), [#allocation2], %s828_s18 }
  0x53   : > { %618 = dma.done.wait (%p911_p8), %s180_s4, 512  }
  0x54   : > { %620 = vsyncadd (%p911_p8), %s180_s4, 4294966784  ;;  %s189_s5 = scalar_lea.sflag [#allocation6], %s825_s15  ;;  %s192_s7 = scalar_lea.vmem [#allocation5], %s828_s18 }
  0x55   : > { %622 = dma.done.wait (%p911_p8), %s189_s5, 512  }
  0x56   : > { %624 = vsyncadd (%p911_p8), %s189_s5, 4294966784  ;;  %v229_v0 = vlaneseq  ;;  %s428_s16 = sshll.u32 %s643_s12, 3  ;;  %v240_v3 = vld [vmem:[%s183_s6] sm:$0xff]  ;;  %v241_v5 = vld [vmem:[%s183_s6 + $0x8] sm:$0xff]  ;;  %s436_s21 = sshll.u32 %s643_s12, 9 }
  0x57   : > { %v264_v2 = vstv %s428_s16  ;;  %v244_v4 = vld [vmem:[%s192_s7] sm:$0xff]  ;;  %v245_v7 = vld [vmem:[%s192_s7 + $0x8] sm:$0xff]  ;;  %v242_v8 = vld [vmem:[%s183_s6 + $0x10] sm:$0xff]  ;;  %s217_s19 = scalar_lea.vmem [#allocation7], %s828_s18  ;;  %s848_s28 = scalar_lea.hbm %s899_s2, %s436_s21 }
  0x58   : > { %v230_v1 = vshrl.u32 %v229_v0, 7  ;;  %v248_v6 = vsub.f32 %v240_v3, %v244_v4  ;;  %v246_v9 = vld [vmem:[%s192_s7 + $0x10] sm:$0xff]  ;;  %v249_v11 = vsub.f32 %v241_v5, %v245_v7  ;;  %v243_v13 = vld [vmem:[%s183_s6 + $0x18] sm:$0xff]  ;;  %s307_s30 = sshll.u32 %s217_s19, 4  ;;  %s293_s12 = scalar_lea.sflag [#allocation4], %s825_s15  ;;  %s850_s30 = int_to_ptr.vmem [resolvable:$true] %s307_s30 }
  0x59   : > { %v250_v12 = vsub.f32 %v242_v8, %v246_v9  ;;  %v247_v14 = vld [vmem:[%s192_s7 + $0x18] sm:$0xff]  ;;  %s565_s29 = scalar_lea.vmem %s850_s30, 512  ;;  %p912_p5 = scmp.ne.s32.totalorder %s904_s22, 0 }
  0x5a   : > { %v265_v10 = vadd.s32 %v264_v2, %v230_v1  ;;  %v252_v15 = vmul.f32 %v248_v6, %v248_v6  ;;  %v251_v16 = vsub.f32 %v243_v13, %v247_v14  ;;  %v253_v17 = vmul.f32 %v249_v11, %v249_v11  ;;  %p566_p0 = scmp.ne.s32.totalorder %s850_s30, %s565_s29  ;;  %s655_s25 = smov [#allocation7]  }
  0x5b   : > { %v254_v18 = vmul.f32 %v250_v12, %v250_v12  ;;  %s569_s26 = sshll.u32 %s655_s25, 4  ;;  %s570_s26 = int_to_ptr.vmem [resolvable:$false] %s569_s26 }
  0x5c   : > { %v256_v19 = vmul.f32 %v252_v15, %v252_v15  ;;  %v255_v20 = vmul.f32 %v251_v16, %v251_v16  ;;  %vm266_vm0 = vcmp.lt.s32.totalorder %v265_v10, 4  ;;  %v257_v21 = vmul.f32 %v253_v17, %v253_v17  ;;  %p567_p7 = pnand %p566_p0, %p912_p5  ;;  %s571_s3 = scalar_lea.vmem %s570_s26, 1024 }
  0x5d   : > { %v258_v22 = vmul.f32 %v254_v18, %v254_v18  ;;  %p572_p10 = scmp.lt.s32.totalorder %s850_s30, %s570_s26  ;;  %p573_p12 = scmp.lt.s32.totalorder %s571_s3, %s565_s29 }
  0x5e   : > { %v260_v23 = vmax.f32 %v256_v19, 1e-06  ;;  %v259_v24 = vmul.f32 %v255_v20, %v255_v20  ;;  %v261_v25 = vmax.f32 %v257_v21, 1e-06  ;;  %p568_p4 = pneg %p567_p7 }
  0x5f   : > { %v262_v26 = vmax.f32 %v258_v22, 1e-06  ;;  %p574_p1 = por %p573_p12, %p572_p10 }
  0x60   : > { %v276_v27 = vsel %vm266_vm0, %v260_v23, 0.0  ;;  %v263_v28 = vmax.f32 %v259_v24, 1e-06  ;;  %v277_v29 = vsel %vm266_vm0, %v261_v25, 0.0 }
  0x61   : > { %v278_v30 = vsel %vm266_vm0, %v262_v26, 0.0  ;;  %288 = vst [vmem:[%s217_s19] sm:$0xff] %v276_v27  ;;  %289 = vst [vmem:[%s217_s19 + $0x8] sm:$0xff] %v277_v29  ;;  %p575_p2 = pnand %p574_p1, %p568_p4 }
  0x62   : > { %v279_v31 = vsel %vm266_vm0, %v263_v28, 0.0  ;;  %290 = vst [vmem:[%s217_s19 + $0x10] sm:$0xff] %v278_v30 }
  0x63   : > { %291 = vst [vmem:[%s217_s19 + $0x18] sm:$0xff] %v279_v31 }
  0x64   : > { %578 = shalt.err (!%p575_p2)
}
  0x65   : > { %s579_s8 = scalar_lea.hbm %s848_s28, 512  ;;  %s583_s4 = scalar_lea.hbm %s899_s2, 1024 }
  0x66   : > { %p580_p9 = scmp.ne.s32.totalorder %s848_s28, %s579_s8  ;;  %p584_p6 = scmp.lt.u32.totalorder %s848_s28, %s899_s2 }
  0x67   : > { %p585_p13 = scmp.lt.u32.totalorder %s583_s4, %s579_s8  ;;  %p587_p0 = scmp.lt.u32.totalorder %s579_s8, %s848_s28 }
  0x68   : > { %p581_p11 = pnand %p580_p9, %p912_p5 }
  0x69   : > { %p586_p8 = por %p585_p13, %p584_p6 }
  0x6a   : > { %p582_p3 = pneg %p581_p11 }
  0x6b   : > { %p588_p7 = por %p587_p0, %p586_p8 }
  0x6d   : > { %p589_p4 = pnand %p588_p7, %p582_p3 }
  0x6f   : > { %592 = shalt.err (!%p589_p4)
}
  0x70   : > { %441 = dma.vmem_to_hbm [thread:$0]  (%p912_p5), %s850_s30, 512, %s848_s28, %s293_s12  }
  0x71 PF: > { %s319_s7 = sand.u32 1, %s631_s9   ;;  %p913_p10 = scmp.ne.s32.totalorder %s905_s24, 0 }
  0x72   : > { %p914_p12 = scmp.ge.s32.totalorder %s651_s14, 2  ;;  %s320_s16 = scalar_lea.sflag [#allocation4], %s319_s7 }
  0x74   : > { %p451_p1 = pnand %p914_p12, %p913_p10 }
  0x76   : > { %626 = dma.done.wait (!%p451_p1), %s320_s16, 512  }
  0x77   : > { %628 = vsyncadd (!%p451_p1), %s320_s16, 4294966784  ;;  %s21_s14 = sadd.s32 1, %s651_s14   ;;  %s915_s9 = smov %s635_s10 }
  0x78   : > { %p18_p2 = scmp.ge.s32.totalorder %s21_s14, 4   ;;  %s916_s10 = smov %s639_s11 }
  0x79   : > { %s917_s11 = smov %s727_s23  ;;  %s918_s12 = smov %s647_s13 }
  0x7a   : > { %s919_s13 = smov %s921_s17  ;;  %20 = sbr.rel (!%p18_p2) target bundleno = 8 (0x8), region = 90 }
  0x81   :  { %325 = vsyncpa [#allocation3], 1 }
  0x82   :  { %327 = vsyncpa [#allocation3 + $0x1], 1 }
  0x83   :  { %328 = vsyncpa [#allocation6], 1 }
  0x84   :  { %330 = vsyncpa [#allocation6 + $0x1], 1 }
  0x85   :  { %331 = vsyncpa [#allocation4], 1 }
  0x86   :  { %333 = vsyncpa [#allocation4 + $0x1], 1 }

</bundles_post_ra>
